<compile_context>
chip_gen: v6e
topology: v6e:2x2x1
jax: 0.10.0
libtpu: 0.0.40
codegen_flags: <defaults>
</compile_context>

<pallas_src>
import functools

import jax
import jax.numpy as jnp
from jax.experimental import pallas as pl
from jax.experimental.pallas import tpu as pltpu

TEMP = 0.66
NUM_PIXELS = 784
NUM_HIDDEN1 = 400
NUM_HIDDEN2 = 200
Z_SHARED = 10
Z_PRIVATE = 50
STATS_DIM = 2 * Z_PRIVATE + Z_SHARED  # 110

# Lane-aligned (padded) dims used inside the kernel.
HIDDEN1_PAD = 512
HIDDEN2_PAD = 256
STATS_PAD = 128

TILE_M_MAX = 512


def _round_up(x, m):
    return ((x + m - 1) // m) * m


def encoder_kernel(x_ref, w1_ref, b1_ref, w2_ref, b2_ref, w3_ref, b3_ref,
                   stats_ref):
    # enc_hidden: Linear(784->400) -> ReLU -> Linear(400->200) -> ReLU
    # (all feature dims padded to 128-multiples; pads stay exactly zero).
    h1 = jnp.dot(x_ref[...], w1_ref[...],
                 preferred_element_type=jnp.float32) + b1_ref[...]
    h1 = jnp.maximum(h1, 0.0).astype(jnp.bfloat16)
    h2 = jnp.dot(h1, w2_ref[...],
                 preferred_element_type=jnp.float32) + b2_ref[...]
    h2 = jnp.maximum(h2, 0.0).astype(jnp.bfloat16)
    # fc: Linear(200 -> 110), padded to 128 lanes -> single lane-dense store.
    stats_ref[...] = jnp.dot(h2, w3_ref[...],
                             preferred_element_type=jnp.float32) + b3_ref[...]


@functools.partial(jax.jit, static_argnames=())
def encoder_forward(x_flat, kparams):
    """x_flat: (M, NUM_PIXELS) float32.  Returns raw stats (M, STATS_DIM)."""
    M = x_flat.shape[0]
    w1, b1, w2, b2, w3, b3 = kparams

    # Tile the row dimension; pad M so the grid divides exactly.
    tile_m = min(TILE_M_MAX, _round_up(M, 8))
    m_pad = _round_up(M, tile_m)
    if m_pad != M:
        x_flat = jnp.pad(x_flat, ((0, m_pad - M), (0, 0)))
    x_bf16 = x_flat.astype(jnp.bfloat16)

    grid = (m_pad // tile_m,)

    const = lambda shape: pl.BlockSpec(shape, lambda i: (0,) * len(shape))

    flops = 2 * m_pad * (NUM_PIXELS * HIDDEN1_PAD
                         + HIDDEN1_PAD * HIDDEN2_PAD
                         + HIDDEN2_PAD * STATS_PAD)
    bytes_accessed = (
        x_bf16.size * 2
        + (w1.size + w2.size + w3.size) * 2
        + (b1.size + b2.size + b3.size) * 4
        + m_pad * STATS_PAD * 4)

    stats_pad = pl.pallas_call(
        encoder_kernel,
        out_shape=jax.ShapeDtypeStruct((m_pad, STATS_PAD), jnp.float32),
        grid_spec=pl.GridSpec(
            grid=grid,
            in_specs=[
                pl.BlockSpec((tile_m, NUM_PIXELS), lambda i: (i, 0)),
                const((NUM_PIXELS, HIDDEN1_PAD)),
                const((1, HIDDEN1_PAD)),
                const((HIDDEN1_PAD, HIDDEN2_PAD)),
                const((1, HIDDEN2_PAD)),
                const((HIDDEN2_PAD, STATS_PAD)),
                const((1, STATS_PAD)),
            ],
            out_specs=pl.BlockSpec((tile_m, STATS_PAD), lambda i: (i, 0)),
        ),
        compiler_params=pltpu.CompilerParams(
            dimension_semantics=("parallel",)),
        cost_estimate=pl.CostEstimate(
            flops=flops, transcendentals=0, bytes_accessed=bytes_accessed),
    )(x_bf16, w1, b1, w2, b2, w3, b3)

    return stats_pad[:M, :STATS_DIM]


def init_params(key):
    """Deterministic parameter init (shapes match EncoderA.__init__)."""
    ks = jax.random.split(key, 6)

    def lin(kw, kb, fan_in, fan_out):
        bound = 1.0 / jnp.sqrt(fan_in)
        w = jax.random.uniform(kw, (fan_in, fan_out), jnp.float32, -bound, bound)
        b = jax.random.uniform(kb, (1, fan_out), jnp.float32, -bound, bound)
        return w, b

    w1, b1 = lin(ks[0], ks[1], NUM_PIXELS, NUM_HIDDEN1)
    w2, b2 = lin(ks[2], ks[3], NUM_HIDDEN1, NUM_HIDDEN2)
    w3, b3 = lin(ks[4], ks[5], NUM_HIDDEN2, STATS_DIM)
    return (w1, b1, w2, b2, w3, b3)


def pad_and_cast_params(params):
    """Zero-pad feature dims to 128-multiples and cast weights to bf16.

    Padded weight columns and bias entries are exactly zero, so the padded
    activations stay zero through the ReLUs and results are unchanged.
    """
    w1, b1, w2, b2, w3, b3 = params

    def pad2(a, rows, cols):
        return jnp.pad(a, ((0, rows - a.shape[0]), (0, cols - a.shape[1])))

    w1p = pad2(w1, NUM_PIXELS, HIDDEN1_PAD).astype(jnp.bfloat16)
    b1p = pad2(b1, 1, HIDDEN1_PAD).astype(jnp.float32)
    w2p = pad2(w2, HIDDEN1_PAD, HIDDEN2_PAD).astype(jnp.bfloat16)
    b2p = pad2(b2, 1, HIDDEN2_PAD).astype(jnp.float32)
    w3p = pad2(w3, HIDDEN2_PAD, STATS_PAD).astype(jnp.bfloat16)
    b3p = pad2(b3, 1, STATS_PAD).astype(jnp.float32)
    return (w1p, b1p, w2p, b2p, w3p, b3p)


def encoder_a(x, kparams, sample_key):
    """x: (num_samples, batch, num_pixels).  Mirrors EncoderA.forward:
    returns dict with the 'privateA' (Normal) and 'sharedA' (Concrete)
    samples plus their distribution parameters."""
    S, B, P = x.shape
    x_flat = x.reshape(S * B, P)

    stats = encoder_forward(x_flat, kparams)          # (M, 110), lane-dense kernel output
    mu = stats[:, :Z_PRIVATE]
    logvar = stats[:, Z_PRIVATE:2 * Z_PRIVATE]
    std = jnp.exp(0.5 * logvar)                       # == sqrt(exp(logvar)), one transcendental
    logits = stats[:, 2 * Z_PRIVATE:STATS_DIM]        # padded logits already sliced off

    mu = mu.reshape(S, B, Z_PRIVATE)
    std = std.reshape(S, B, Z_PRIVATE)
    logits = logits.reshape(S, B, Z_SHARED)

    # TODO(synk): probtorch.Trace bookkeeping (log-prob accumulation) has no
    # Pallas equivalent; only the sampling semantics are reproduced here.
    k_norm, k_gumbel = jax.random.split(sample_key)
    # q.normal(loc=muPrivate, scale=stdPrivate) -- reparameterized sample
    privateA = mu + std * jax.random.normal(k_norm, mu.shape, jnp.float32)
    # q.concrete(logits=shared_logit, temperature=0.66) -- Gumbel-softmax
    g = -jnp.log(-jnp.log(
        jax.random.uniform(k_gumbel, logits.shape, jnp.float32, 1e-10, 1.0)))
    sharedA = jax.nn.softmax((logits + g) / TEMP, axis=-1)

    return {
        "privateA": privateA, "privateA_loc": mu, "privateA_scale": std,
        "sharedA": sharedA, "sharedA_logits": logits,
    }


if __name__ == "__main__":
    key = jax.random.PRNGKey(0)
    k_param, k_x, k_sample = jax.random.split(key, 3)

    params = init_params(k_param)
    kparams = pad_and_cast_params(params)

    # small shapes: num_samples=2, batch=8, num_pixels=784 (fixed by module)
    S, B = 2, 8
    x = jax.random.uniform(k_x, (S, B, NUM_PIXELS), jnp.float32)

    out = encoder_a(x, kparams, k_sample)
    jax.block_until_ready(out)

    assert out["privateA"].shape == (S, B, Z_PRIVATE)
    assert out["privateA_scale"].shape == (S, B, Z_PRIVATE)
    assert out["sharedA"].shape == (S, B, Z_SHARED)
    assert bool(jnp.all(out["privateA_scale"] > 0.0))
    assert bool(jnp.allclose(jnp.sum(out["sharedA"], axis=-1), 1.0, atol=1e-5))

    # sanity: bf16 kernel matmuls track an f32 reference within bf16 tolerance
    w1, b1, w2, b2, w3, b3 = params
    xf = x.reshape(S * B, NUM_PIXELS)
    h1 = jnp.maximum(xf @ w1 + b1, 0.0)
    h2 = jnp.maximum(h1 @ w2 + b2, 0.0)
    stats_ref = h2 @ w3 + b3
    mu_ref = stats_ref[:, :Z_PRIVATE].reshape(S, B, Z_PRIVATE)
    assert bool(jnp.allclose(out["privateA_loc"], mu_ref, atol=5e-2, rtol=5e-2))

    print("KERNEL_OK")
</pallas_src>

<mosaic_0001>
module attributes {stable_mosaic.version = 11 : i64} {
  func.func @encoder_kernel(%arg0: i32, %arg1: memref<16x784xbf16, #tpu.memory_space<vmem>>, %arg2: memref<784x512xbf16, #tpu.memory_space<vmem>>, %arg3: memref<1x512xf32, #tpu.memory_space<vmem>>, %arg4: memref<512x256xbf16, #tpu.memory_space<vmem>>, %arg5: memref<1x256xf32, #tpu.memory_space<vmem>>, %arg6: memref<256x128xbf16, #tpu.memory_space<vmem>>, %arg7: memref<1x128xf32, #tpu.memory_space<vmem>>, %arg8: memref<16x128xf32, #tpu.memory_space<vmem>>) attributes {dimension_semantics = [#tpu.dimension_semantics<parallel>], iteration_bounds = array<i64: 1>, scalar_prefetch = 0 : i64, scratch_operands = 0 : i64, tpu.core_type = #tpu.core_type<tc>, window_params = [{transform_indices = @transform_0, window_bounds = array<i64: 16, 784>}, {pipeline_mode = #tpu.pipeline_mode<synchronous>, transform_indices = @transform_1, window_bounds = array<i64: 784, 512>}, {pipeline_mode = #tpu.pipeline_mode<synchronous>, transform_indices = @transform_2, window_bounds = array<i64: 1, 512>}, {pipeline_mode = #tpu.pipeline_mode<synchronous>, transform_indices = @transform_3, window_bounds = array<i64: 512, 256>}, {pipeline_mode = #tpu.pipeline_mode<synchronous>, transform_indices = @transform_4, window_bounds = array<i64: 1, 256>}, {pipeline_mode = #tpu.pipeline_mode<synchronous>, transform_indices = @transform_5, window_bounds = array<i64: 256, 128>}, {pipeline_mode = #tpu.pipeline_mode<synchronous>, transform_indices = @transform_6, window_bounds = array<i64: 1, 128>}, {transform_indices = @transform_7, window_bounds = array<i64: 16, 128>}]} {
    %c0 = arith.constant 0 : index
    %c0_0 = arith.constant 0 : index
    %0 = vector.load %arg1[%c0, %c0_0] : memref<16x784xbf16, #tpu.memory_space<vmem>>, vector<16x784xbf16>
    %c0_1 = arith.constant 0 : index
    %c0_2 = arith.constant 0 : index
    %1 = vector.load %arg2[%c0_1, %c0_2] : memref<784x512xbf16, #tpu.memory_space<vmem>>, vector<784x512xbf16>
    %cst = arith.constant dense<0.000000e+00> : vector<16x512xf32>
    %2 = tpu.matmul %0, %1, %cst {dimension_numbers = #tpu.dot_dimension_numbers<[1], [0], [0], [1], [0, 0, 1, 1], [], []>} : vector<16x784xbf16>, vector<784x512xbf16>, vector<16x512xf32> -> vector<16x512xf32>
    %c0_3 = arith.constant 0 : index
    %c0_4 = arith.constant 0 : index
    %3 = vector.load %arg3[%c0_3, %c0_4] : memref<1x512xf32, #tpu.memory_space<vmem>>, vector<1x512xf32>
    %4 = vector.broadcast %3 : vector<1x512xf32> to vector<16x512xf32>
    %5 = arith.addf %2, %4 : vector<16x512xf32>
    %cst_5 = arith.constant 0.000000e+00 : f32
    %6 = vector.broadcast %cst_5 : f32 to vector<16x512xf32>
    %7 = arith.maximumf %5, %6 : vector<16x512xf32>
    %8 = arith.truncf %7 : vector<16x512xf32> to vector<16x512xbf16>
    %c0_6 = arith.constant 0 : index
    %c0_7 = arith.constant 0 : index
    %9 = vector.load %arg4[%c0_6, %c0_7] : memref<512x256xbf16, #tpu.memory_space<vmem>>, vector<512x256xbf16>
    %cst_8 = arith.constant dense<0.000000e+00> : vector<16x256xf32>
    %10 = tpu.matmul %8, %9, %cst_8 {dimension_numbers = #tpu.dot_dimension_numbers<[1], [0], [0], [1], [0, 0, 1, 1], [], []>} : vector<16x512xbf16>, vector<512x256xbf16>, vector<16x256xf32> -> vector<16x256xf32>
    %c0_9 = arith.constant 0 : index
    %c0_10 = arith.constant 0 : index
    %11 = vector.load %arg5[%c0_9, %c0_10] : memref<1x256xf32, #tpu.memory_space<vmem>>, vector<1x256xf32>
    %12 = vector.broadcast %11 : vector<1x256xf32> to vector<16x256xf32>
    %13 = arith.addf %10, %12 : vector<16x256xf32>
    %cst_11 = arith.constant 0.000000e+00 : f32
    %14 = vector.broadcast %cst_11 : f32 to vector<16x256xf32>
    %15 = arith.maximumf %13, %14 : vector<16x256xf32>
    %16 = arith.truncf %15 : vector<16x256xf32> to vector<16x256xbf16>
    %c0_12 = arith.constant 0 : index
    %c0_13 = arith.constant 0 : index
    %17 = vector.load %arg6[%c0_12, %c0_13] : memref<256x128xbf16, #tpu.memory_space<vmem>>, vector<256x128xbf16>
    %cst_14 = arith.constant dense<0.000000e+00> : vector<16x128xf32>
    %18 = tpu.matmul %16, %17, %cst_14 {dimension_numbers = #tpu.dot_dimension_numbers<[1], [0], [0], [1], [0, 0, 1, 1], [], []>} : vector<16x256xbf16>, vector<256x128xbf16>, vector<16x128xf32> -> vector<16x128xf32>
    %c0_15 = arith.constant 0 : index
    %c0_16 = arith.constant 0 : index
    %19 = vector.load %arg7[%c0_15, %c0_16] : memref<1x128xf32, #tpu.memory_space<vmem>>, vector<1x128xf32>
    %20 = vector.broadcast %19 : vector<1x128xf32> to vector<16x128xf32>
    %21 = arith.addf %18, %20 : vector<16x128xf32>
    %c0_17 = arith.constant 0 : index
    %c0_18 = arith.constant 0 : index
    %22 = vector.load %arg8[%c0_17, %c0_18] : memref<16x128xf32, #tpu.memory_space<vmem>>, vector<16x128xf32>
    tpu.vector_store %arg8[%c0_17, %c0_18], %21 {strides = array<i32>} : memref<16x128xf32, #tpu.memory_space<vmem>>, vector<16x128xf32>,
    return
  }
  func.func @transform_0(%arg0: i32) -> (i32, i32) {
    %c0_i32 = arith.constant 0 : i32
    %c0_i32_0 = arith.constant 0 : i32
    return %arg0, %c0_i32 : i32, i32
  }
  func.func @transform_1(%arg0: i32) -> (i32, i32) {
    %c0_i32 = arith.constant 0 : i32
    %c0_i32_0 = arith.constant 0 : i32
    %c0_i32_1 = arith.constant 0 : i32
    return %c0_i32, %c0_i32_0 : i32, i32
  }
  func.func @transform_2(%arg0: i32) -> (i32, i32) {
    %c0_i32 = arith.constant 0 : i32
    %c0_i32_0 = arith.constant 0 : i32
    %c0_i32_1 = arith.constant 0 : i32
    return %c0_i32, %c0_i32_0 : i32, i32
  }
  func.func @transform_3(%arg0: i32) -> (i32, i32) {
    %c0_i32 = arith.constant 0 : i32
    %c0_i32_0 = arith.constant 0 : i32
    %c0_i32_1 = arith.constant 0 : i32
    return %c0_i32, %c0_i32_0 : i32, i32
  }
  func.func @transform_4(%arg0: i32) -> (i32, i32) {
    %c0_i32 = arith.constant 0 : i32
    %c0_i32_0 = arith.constant 0 : i32
    %c0_i32_1 = arith.constant 0 : i32
    return %c0_i32, %c0_i32_0 : i32, i32
  }
  func.func @transform_5(%arg0: i32) -> (i32, i32) {
    %c0_i32 = arith.constant 0 : i32
    %c0_i32_0 = arith.constant 0 : i32
    %c0_i32_1 = arith.constant 0 : i32
    return %c0_i32, %c0_i32_0 : i32, i32
  }
  func.func @transform_6(%arg0: i32) -> (i32, i32) {
    %c0_i32 = arith.constant 0 : i32
    %c0_i32_0 = arith.constant 0 : i32
    %c0_i32_1 = arith.constant 0 : i32
    return %c0_i32, %c0_i32_0 : i32, i32
  }
  func.func @transform_7(%arg0: i32) -> (i32, i32) {
    %c0_i32 = arith.constant 0 : i32
    %c0_i32_0 = arith.constant 0 : i32
    return %arg0, %c0_i32 : i32, i32
  }
}

</mosaic_0001>

<bundles_post_ra>
// kernel: encoder_forward.1
= control target key start
LH: loop header
LB: loop body
LE: loop exit
PB: predicated region body
PF: predicated region fallthrough
CT: control target
= control target key end

     0   :  { %12 = vsyncpa [#allocation3], 0  ;;  %s3326_s0 = inlined_call_operand.vmem [shape: bf16[16,784], index: 0, kind: input, shape index: {}]   ;;  %s3327_s1 = inlined_call_operand.hbm [shape: bf16[784,512], index: 1, kind: input, shape index: {}]   ;;  %s3328_s2 = inlined_call_operand.vmem [shape: f32[1,512], index: 2, kind: input, shape index: {}]   ;;  %s3329_s3 = inlined_call_operand.hbm [shape: bf16[512,256], index: 3, kind: input, shape index: {}]   ;;  %s3330_s4 = inlined_call_operand.vmem [shape: f32[1,256], index: 4, kind: input, shape index: {}]   ;;  %s3331_s5 = inlined_call_operand.vmem [shape: bf16[256,128], index: 5, kind: input, shape index: {}]   ;;  %s3332_s6 = inlined_call_operand.vmem [shape: f32[1,128], index: 6, kind: input, shape index: {}]   ;;  %s3333_s7 = inlined_call_operand.hbm [shape: f32[16,128], index: 7, kind: output, shape index: {}]  }
   0x1   :  { %13 = vsyncpa [#allocation6], 0 }
   0x2   :  { %14 = vsyncpa [#allocation4], 0  ;;  %s3139_s24 = smov [#allocation2]  }
   0x3   :  { %s22_s25 = sshll.u32 %s3139_s24, 4  ;;  %s23_s25 = int_to_ptr.vmem [resolvable:$true] %s22_s25 }
   0x4   :  { %s3081_s26 = scalar_lea.vmem %s23_s25, 25088  ;;  %p3086_p1 = scmp.lt.s32.totalorder %s23_s25, %s23_s25 }
   0x5   :  { %p3082_p0 = scmp.ne.s32.totalorder %s23_s25, %s3081_s26  ;;  %p3087_p2 = scmp.lt.s32.totalorder %s3081_s26, %s3081_s26 }
   0x7   :  { %p3088_p3 = por %p3087_p2, %p3086_p1 }
   0x9   :  { %p3089_p4 = pnand %p3088_p3, %p3082_p0 }
   0xb   :  { %3092 = shalt.err (!%p3089_p4)
}
   0xc   :  { %s3140_s27 = smov 256   ;;  %s3141_s28 = smov 16  }
   0xd   :  { %28 = dma.hbm_to_vmem [thread:$0]  %s3327_s1, 25088, %s23_s25, [#allocation3], %s3140_s27, %s3140_s27, %s3141_s28  }
   0xe   :  { %s3142_s8 = smov [#allocation5]  }
   0xf   :  { %s36_s9 = sshll.u32 %s3142_s8, 4  ;;  %s37_s9 = int_to_ptr.vmem [resolvable:$true] %s36_s9 }
  0x10   :  { %s3101_s10 = scalar_lea.vmem %s37_s9, 8192  ;;  %p3106_p6 = scmp.lt.s32.totalorder %s37_s9, %s37_s9 }
  0x11   :  { %p3102_p5 = scmp.ne.s32.totalorder %s37_s9, %s3101_s10  ;;  %p3107_p7 = scmp.lt.s32.totalorder %s3101_s10, %s3101_s10 }
  0x13   :  { %p3108_p8 = por %p3107_p7, %p3106_p6 }
  0x15   :  { %p3109_p9 = pnand %p3108_p8, %p3102_p5 }
  0x17   :  { %3112 = shalt.err (!%p3109_p9)
}
  0x18   :  { %s3143_s11 = smov 128   ;;  %s3144_s12 = smov 8  }
  0x19   :  { %42 = dma.hbm_to_vmem [thread:$0]  %s3329_s3, 8192, %s37_s9, [#allocation6], %s3143_s11, %s3143_s11, %s3144_s12  }
  0x1a   :  { %3133 = dma.done.wait [#allocation3], 25088  }
  0x1b   :  { %3134 = vsyncadd [#allocation3], 4294942208 }
  0x1c   :  { %3135 = dma.done.wait [#allocation6], 8192  }
  0x1d   :  { %3136 = vsyncadd [#allocation6], 4294959104  ;;  %v2657_v0 = vld [vmem:[#allocation2 + $0xe4] ss:$16 sps:$4 sm:$0xff]   ;;  %v2661_v2 = vld [vmem:[#allocation2 + $0xe0] ss:$16 sps:$4 sm:$0xff]  }
  0x1e   :  { %v2659_v1 = vld [vmem:[#allocation2 + $0x2e4] ss:$16 sps:$4 sm:$0xff]   ;;  %1301 = vmatprep.subr.bf16.mxu0 %v2657_v0  ;;  %v2662_v3 = vld [vmem:[#allocation2 + $0x2e0] ss:$16 sps:$4 sm:$0xff]   ;;  %v3204_v51 = vld [vmem:[%s3326_s0 + $0xc] ss:$28 sps:$4 sm:$0xff]  }
  0x1f   :  { %1344 = vmatprep.subr.bf16.mxu1 %v2659_v1  ;;  %v2663_v4 = vld [vmem:[#allocation2 + $0xc4] ss:$16 sps:$4 sm:$0xff]   ;;  %1302 = vmatpush1.bf16.msra.mxu0 %v2661_v2  ;;  %v2667_v6 = vld [vmem:[#allocation2 + $0xc0] ss:$16 sps:$4 sm:$0xff]   ;;  %vm1297_vm0 = vcmask 130048   ;;  %s3146_s1 = smov [#allocation7]  }
  0x20   :  { %1345 = vmatpush1.bf16.msra.mxu1 %v2662_v3  ;;  %v2665_v5 = vld [vmem:[#allocation2 + $0x2c4] ss:$16 sps:$4 sm:$0xff]   ;;  %1303 = vmatprep.subr.bf16.mxu0 %v2663_v4  ;;  %v2668_v7 = vld [vmem:[#allocation2 + $0x2c0] ss:$16 sps:$4 sm:$0xff]   ;;  %s2328_s3 = sshll.u32 %s3146_s1, 4  ;;  %s2329_s3 = int_to_ptr.vmem [resolvable:$true] %s2328_s3 }
  0x21   :  { %1346 = vmatprep.subr.bf16.mxu1 %v2665_v5  ;;  %v2669_v8 = vld [vmem:[#allocation2 + $0xa4] ss:$16 sps:$4 sm:$0xff]   ;;  %v2673_v10 = vld [vmem:[#allocation2 + $0xa0] ss:$16 sps:$4 sm:$0xff]   ;;  %1376 = vmatprep.mubr.bf16.mxu1 %v3204_v51  ;;  %s3113_s15 = scalar_lea.vmem %s2329_s3, 256  ;;  %p3118_p11 = scmp.lt.s32.totalorder %s2329_s3, %s2329_s3 }
  0x22   :  { %v2671_v9 = vld [vmem:[#allocation2 + $0x2a4] ss:$16 sps:$4 sm:$0xff]   ;;  %v2674_v11 = vld [vmem:[#allocation2 + $0x2a0] ss:$16 sps:$4 sm:$0xff]   ;;  %p3114_p10 = scmp.ne.s32.totalorder %s2329_s3, %s3113_s15  ;;  %p3119_p12 = scmp.lt.s32.totalorder %s3113_s15, %s3113_s15 }
  0x23   :  { %1304 = vmatpush1.bf16.msra.mxu0 %v2667_v6  ;;  %v2675_v12 = vld [vmem:[#allocation2 + $0x84] ss:$16 sps:$4 sm:$0xff]   ;;  %v2679_v14 = vld [vmem:[#allocation2 + $0x80] ss:$16 sps:$4 sm:$0xff]  }
  0x24   :  { %1347 = vmatpush1.bf16.msra.mxu1 %v2668_v7  ;;  %1305 = vmatprep.subr.bf16.mxu0 %v2669_v8  ;;  %v2677_v13 = vld [vmem:[#allocation2 + $0x284] ss:$16 sps:$4 sm:$0xff]   ;;  %v2680_v15 = vld [vmem:[#allocation2 + $0x280] ss:$16 sps:$4 sm:$0xff]   ;;  %p3120_p13 = por %p3119_p12, %p3118_p11 }
  0x25   :  { %1348 = vmatprep.subr.bf16.mxu1 %v2671_v9  ;;  %v2681_v16 = vld [vmem:[#allocation2 + $0x64] ss:$16 sps:$4 sm:$0xff]   ;;  %v2685_v18 = vld [vmem:[#allocation2 + $0x60] ss:$16 sps:$4 sm:$0xff]   ;;  %v2770_v9 = vld [vmem:[#allocation2 + $0xec] ss:$16 sps:$4 sm:$0xff]  }
  0x26   :  { %v2683_v17 = vld [vmem:[#allocation2 + $0x264] ss:$16 sps:$4 sm:$0xff]   ;;  %v2686_v19 = vld [vmem:[#allocation2 + $0x260] ss:$16 sps:$4 sm:$0xff]   ;;  %p3121_p0 = pnand %p3120_p13, %p3114_p10 }
  0x27   :  { %1306 = vmatpush1.bf16.msra.mxu0 %v2673_v10  ;;  %v2687_v20 = vld [vmem:[#allocation2 + $0x44] ss:$16 sps:$4 sm:$0xff]   ;;  %v2691_v22 = vld [vmem:[#allocation2 + $0x40] ss:$16 sps:$4 sm:$0xff]  }
  0x28   :  { %1349 = vmatpush1.bf16.msra.mxu1 %v2674_v11  ;;  %1307 = vmatprep.subr.bf16.mxu0 %v2675_v12  ;;  %v2689_v21 = vld [vmem:[#allocation2 + $0x244] ss:$16 sps:$4 sm:$0xff]   ;;  %v2692_v23 = vld [vmem:[#allocation2 + $0x240] ss:$16 sps:$4 sm:$0xff]   ;;  %v3145_v11 = vmov 0  }
  0x29   :  { %1350 = vmatprep.subr.bf16.mxu1 %v2677_v13  ;;  %v2693_v24 = vld [vmem:[#allocation2 + $0x24] ss:$16 sps:$4 sm:$0xff]   ;;  %v2697_v26 = vld [vmem:[#allocation2 + $0x20] ss:$16 sps:$4 sm:$0xff]   ;;  %v2768_v13 = vld [vmem:[#allocation2 + $0xe8] ss:$16 sps:$4 sm:$0xff]  }
  0x2a   :  { %v2695_v25 = vld [vmem:[#allocation2 + $0x224] ss:$16 sps:$4 sm:$0xff]   ;;  %v2698_v27 = vld [vmem:[#allocation2 + $0x220] ss:$16 sps:$4 sm:$0xff]  }
  0x2b   :  { %1308 = vmatpush1.bf16.msra.mxu0 %v2679_v14  ;;  %v2699_v28 = vld [vmem:[#allocation2 + $0x4] ss:$16 sps:$4 sm:$0xff]   ;;  %v2703_v30 = vld [vmem:[#allocation2] ss:$16 sps:$4 sm:$0xff]  }
  0x2c   :  { %1351 = vmatpush1.bf16.msra.mxu1 %v2680_v15  ;;  %1309 = vmatprep.subr.bf16.mxu0 %v2681_v16  ;;  %v2701_v29 = vld [vmem:[#allocation2 + $0x204] ss:$16 sps:$4 sm:$0xff]   ;;  %v2704_v31 = vld [vmem:[#allocation2 + $0x200] ss:$16 sps:$4 sm:$0xff]   ;;  %v2777_v16 = vld [vmem:[#allocation2 + $0xcc] ss:$16 sps:$4 sm:$0xff]  }
  0x2d   :  { %1352 = vmatprep.subr.bf16.mxu1 %v2683_v17  ;;  %v2705_v32 = vld [vmem:[#allocation2 + $0x1e4] ss:$16 sps:$4 sm:$0xff]   ;;  %v2709_v34 = vld [vmem:[#allocation2 + $0x1e0] ss:$16 sps:$4 sm:$0xff]  }
  0x2e   :  { %v2707_v33 = vld [vmem:[#allocation2 + $0x3e4] ss:$16 sps:$4 sm:$0xff]   ;;  %v2710_v35 = vld [vmem:[#allocation2 + $0x3e0] ss:$16 sps:$4 sm:$0xff]  }
  0x2f   :  { %1310 = vmatpush1.bf16.msra.mxu0 %v2685_v18  ;;  %v2711_v36 = vld [vmem:[#allocation2 + $0x1c4] ss:$16 sps:$4 sm:$0xff]   ;;  %v2715_v38 = vld [vmem:[#allocation2 + $0x1c0] ss:$16 sps:$4 sm:$0xff]   ;;  %v2775_v18 = vld [vmem:[#allocation2 + $0xc8] ss:$16 sps:$4 sm:$0xff]  }
  0x30   :  { %1353 = vmatpush1.bf16.msra.mxu1 %v2686_v19  ;;  %1311 = vmatprep.subr.bf16.mxu0 %v2687_v20  ;;  %v2713_v37 = vld [vmem:[#allocation2 + $0x3c4] ss:$16 sps:$4 sm:$0xff]   ;;  %v2716_v39 = vld [vmem:[#allocation2 + $0x3c0] ss:$16 sps:$4 sm:$0xff]   ;;  %v2783_v20 = vld [vmem:[#allocation2 + $0xac] ss:$16 sps:$4 sm:$0xff]  }
  0x31   :  { %1354 = vmatprep.subr.bf16.mxu1 %v2689_v21  ;;  %v2717_v40 = vld [vmem:[#allocation2 + $0x1a4] ss:$16 sps:$4 sm:$0xff]   ;;  %v2721_v42 = vld [vmem:[#allocation2 + $0x1a0] ss:$16 sps:$4 sm:$0xff]  }
  0x32   :  { %v2719_v41 = vld [vmem:[#allocation2 + $0x3a4] ss:$16 sps:$4 sm:$0xff]   ;;  %v2722_v43 = vld [vmem:[#allocation2 + $0x3a0] ss:$16 sps:$4 sm:$0xff]  }
  0x33   :  { %1312 = vmatpush1.bf16.msra.mxu0 %v2691_v22  ;;  %v2723_v44 = vld [vmem:[#allocation2 + $0x184] ss:$16 sps:$4 sm:$0xff]   ;;  %v2727_v46 = vld [vmem:[#allocation2 + $0x180] ss:$16 sps:$4 sm:$0xff]   ;;  %v2781_v22 = vld [vmem:[#allocation2 + $0xa8] ss:$16 sps:$4 sm:$0xff]  }
  0x34   :  { %1355 = vmatpush1.bf16.msra.mxu1 %v2692_v23  ;;  %1313 = vmatprep.subr.bf16.mxu0 %v2693_v24  ;;  %v2725_v45 = vld [vmem:[#allocation2 + $0x384] ss:$16 sps:$4 sm:$0xff]   ;;  %v2728_v47 = vld [vmem:[#allocation2 + $0x380] ss:$16 sps:$4 sm:$0xff]   ;;  %v2789_v24 = vld [vmem:[#allocation2 + $0x8c] ss:$16 sps:$4 sm:$0xff]  }
  0x35   :  { %1356 = vmatprep.subr.bf16.mxu1 %v2695_v25  ;;  %v2729_v48 = vld [vmem:[#allocation2 + $0x164] ss:$16 sps:$4 sm:$0xff]   ;;  %v2733_v52 = vld [vmem:[#allocation2 + $0x160] ss:$16 sps:$4 sm:$0xff]  }
  0x36   :  { %v3199_v49 = vld [vmem:[%s3326_s0 + $0x4] ss:$28 sps:$4 sm:$0xff]   ;;  %v3224_v14 = vld [vmem:[%s3326_s0 + $0x18] ss:$28 sps:$4 sm:$0xff]  }
  0x37   :  { %1314 = vmatpush1.bf16.msra.mxu0 %v2697_v26  ;;  %v2731_v50 = vld [vmem:[#allocation2 + $0x364] ss:$16 sps:$4 sm:$0xff]   ;;  %1333 = vmatprep.mubr.bf16.mxu0 %v3199_v49  ;;  %v2734_v53 = vld [vmem:[#allocation2 + $0x360] ss:$16 sps:$4 sm:$0xff]   ;;  %v2787_v26 = vld [vmem:[#allocation2 + $0x88] ss:$16 sps:$4 sm:$0xff]  }
  0x38   :  { %1357 = vmatpush1.bf16.msra.mxu1 %v2698_v27  ;;  %1315 = vmatprep.subr.bf16.mxu0 %v2699_v28  ;;  %v2735_v54 = vld [vmem:[#allocation2 + $0x144] ss:$16 sps:$4 sm:$0xff]   ;;  %v2739_v56 = vld [vmem:[#allocation2 + $0x140] ss:$16 sps:$4 sm:$0xff]   ;;  %v2795_v28 = vld [vmem:[#allocation2 + $0x6c] ss:$16 sps:$4 sm:$0xff]  }
  0x39   :  { %1358 = vmatprep.subr.bf16.mxu1 %v2701_v29  ;;  %v2737_v55 = vld [vmem:[#allocation2 + $0x344] ss:$16 sps:$4 sm:$0xff]   ;;  %v2740_v57 = vld [vmem:[#allocation2 + $0x340] ss:$16 sps:$4 sm:$0xff]  }
  0x3a   :  { %v2741_v58 = vld [vmem:[#allocation2 + $0x124] ss:$16 sps:$4 sm:$0xff]   ;;  %v2745_v60 = vld [vmem:[#allocation2 + $0x120] ss:$16 sps:$4 sm:$0xff]  }
  0x3b   :  { %1316 = vmatpush1.bf16.msra.mxu0 %v2703_v30  ;;  %v2743_v59 = vld [vmem:[#allocation2 + $0x324] ss:$16 sps:$4 sm:$0xff]   ;;  %v2746_v61 = vld [vmem:[#allocation2 + $0x320] ss:$16 sps:$4 sm:$0xff]   ;;  %v2793_v30 = vld [vmem:[#allocation2 + $0x68] ss:$16 sps:$4 sm:$0xff]  }
  0x3c   :  { %1359 = vmatpush1.bf16.msra.mxu1 %v2704_v31  ;;  %1317 = vmatprep.subr.bf16.mxu0 %v2705_v32  ;;  %v2747_v62 = vld [vmem:[#allocation2 + $0x104] ss:$16 sps:$4 sm:$0xff]   ;;  %v2751_v0 = vld [vmem:[#allocation2 + $0x100] ss:$16 sps:$4 sm:$0xff]   ;;  %v2801_v32 = vld [vmem:[#allocation2 + $0x4c] ss:$16 sps:$4 sm:$0xff]  }
  0x3d   :  { %1360 = vmatprep.subr.bf16.mxu1 %v2707_v33  ;;  %v2749_v63 = vld [vmem:[#allocation2 + $0x304] ss:$16 sps:$4 sm:$0xff]   ;;  %v2752_v1 = vld [vmem:[#allocation2 + $0x300] ss:$16 sps:$4 sm:$0xff]  }
  0x3e   :  { %v2761_v2 = vld [vmem:[#allocation2 + $0x4e4] ss:$16 sps:$4 sm:$0xff]   ;;  %v3211_v4 = vld [vmem:[%s3326_s0] ss:$28 sps:$4 sm:$0xff]  }
  0x3f   :  { %1318 = vmatpush2.bf16.msra.mxu0 %v2709_v34  ;;  %v2764_v3 = vld [vmem:[#allocation2 + $0x604] ss:$16 sps:$4 sm:$0xff]   ;;  %v2759_v6 = vld [vmem:[#allocation2 + $0x4e0] ss:$16 sps:$4 sm:$0xff]  }
  0x40   :  { %1361 = vmatpush2.bf16.msra.mxu1 %v2710_v35  ;;  %1319 = vmatprep.subr.bf16.mxu0 %v2711_v36  ;;  %v3216_v5 = vld [vmem:[%s3326_s0 + $0x8] ss:$28 sps:$4 sm:$0xff]   ;;  %v2762_v7 = vld [vmem:[#allocation2 + $0x600] ss:$16 sps:$4 sm:$0xff]  }
  0x41   :  { %1362 = vmatprep.subr.bf16.mxu1 %v2713_v37  ;;  %v2767_v8 = vld [vmem:[#allocation2 + $0x4c4] ss:$16 sps:$4 sm:$0xff]   ;;  %v2765_v10 = vld [vmem:[#allocation2 + $0x4c0] ss:$16 sps:$4 sm:$0xff]   ;;  %v2799_v35 = vld [vmem:[#allocation2 + $0x48] ss:$16 sps:$4 sm:$0xff]  }
  0x42   :  { %v2773_v12 = vld [vmem:[#allocation2 + $0x4a4] ss:$16 sps:$4 sm:$0xff]   ;;  %v2771_v15 = vld [vmem:[#allocation2 + $0x4a0] ss:$16 sps:$4 sm:$0xff]   ;;  %v2807_v37 = vld [vmem:[#allocation2 + $0x2c] ss:$16 sps:$4 sm:$0xff]  }
  0x43   :  { %1320 = vmatpush2.bf16.msra.mxu0 %v2715_v38  ;;  %v2780_v17 = vld [vmem:[#allocation2 + $0x484] ss:$16 sps:$4 sm:$0xff]   ;;  %v2778_v19 = vld [vmem:[#allocation2 + $0x480] ss:$16 sps:$4 sm:$0xff]  }
  0x44   :  { %1363 = vmatpush2.bf16.msra.mxu1 %v2716_v39  ;;  %1321 = vmatprep.subr.bf16.mxu0 %v2717_v40  ;;  %v2786_v21 = vld [vmem:[#allocation2 + $0x464] ss:$16 sps:$4 sm:$0xff]   ;;  %v2784_v23 = vld [vmem:[#allocation2 + $0x460] ss:$16 sps:$4 sm:$0xff]   ;;  %v2805_v39 = vld [vmem:[#allocation2 + $0x28] ss:$16 sps:$4 sm:$0xff]  }
  0x45   :  { %1364 = vmatprep.subr.bf16.mxu1 %v2719_v41  ;;  %v2792_v25 = vld [vmem:[#allocation2 + $0x444] ss:$16 sps:$4 sm:$0xff]   ;;  %v2790_v27 = vld [vmem:[#allocation2 + $0x440] ss:$16 sps:$4 sm:$0xff]   ;;  %v2813_v41 = vld [vmem:[#allocation2 + $0xc] ss:$16 sps:$4 sm:$0xff]  }
  0x46   :  { %v2798_v29 = vld [vmem:[#allocation2 + $0x424] ss:$16 sps:$4 sm:$0xff]   ;;  %v2796_v31 = vld [vmem:[#allocation2 + $0x420] ss:$16 sps:$4 sm:$0xff]  }
  0x47   :  { %1322 = vmatpush2.bf16.msra.mxu0 %v2721_v42  ;;  %v3232_v33 = vld [vmem:[%s3326_s0 + $0x14] ss:$28 sps:$4 sm:$0xff]  }
  0x48   :  { %1365 = vmatpush2.bf16.msra.mxu1 %v2722_v43  ;;  %1323 = vmatprep.subr.bf16.mxu0 %v2723_v44  ;;  %v2804_v34 = vld [vmem:[#allocation2 + $0x404] ss:$16 sps:$4 sm:$0xff]   ;;  %v2802_v36 = vld [vmem:[#allocation2 + $0x400] ss:$16 sps:$4 sm:$0xff]   ;;  %v2811_v43 = vld [vmem:[#allocation2 + $0x8] ss:$16 sps:$4 sm:$0xff]  }
  0x49   :  { %1366 = vmatprep.subr.bf16.mxu1 %v2725_v45  ;;  %v2810_v38 = vld [vmem:[#allocation2 + $0x5e4] ss:$16 sps:$4 sm:$0xff]   ;;  %v2808_v40 = vld [vmem:[#allocation2 + $0x5e0] ss:$16 sps:$4 sm:$0xff]   ;;  %v2819_v45 = vld [vmem:[#allocation2 + $0x1ec] ss:$16 sps:$4 sm:$0xff]  }
  0x4a   :  { %v2816_v42 = vld [vmem:[#allocation2 + $0x5c4] ss:$16 sps:$4 sm:$0xff]   ;;  %v2814_v44 = vld [vmem:[#allocation2 + $0x5c0] ss:$16 sps:$4 sm:$0xff]  }
  0x4b   :  { %1324 = vmatpush2.bf16.msra.mxu0 %v2727_v46  ;;  %v2822_v46 = vld [vmem:[#allocation2 + $0x5a4] ss:$16 sps:$4 sm:$0xff]  }
  0x4c   :  { %1367 = vmatpush2.bf16.msra.mxu1 %v2728_v47  ;;  %1325 = vmatprep.subr.bf16.mxu0 %v2729_v48  ;;  %v2817_v47 = vld [vmem:[#allocation2 + $0x1e8] ss:$16 sps:$4 sm:$0xff]   ;;  %v2820_v48 = vld [vmem:[#allocation2 + $0x5a0] ss:$16 sps:$4 sm:$0xff]  }
  0x4d   :  { %1368 = vmatprep.subr.bf16.mxu1 %v2731_v50  ;;  %v2828_v50 = vld [vmem:[#allocation2 + $0x584] ss:$16 sps:$4 sm:$0xff]  }
  0x4f   :  { %1326 = vmatpush2.bf16.msra.mxu0 %v2733_v52  ;;  %v2823_v52 = vld [vmem:[#allocation2 + $0x1c8] ss:$16 sps:$4 sm:$0xff]  }
  0x50   :  { %1369 = vmatpush2.bf16.msra.mxu1 %v2734_v53  ;;  %1327 = vmatprep.subr.bf16.mxu0 %v2735_v54  ;;  %v2826_v53 = vld [vmem:[#allocation2 + $0x580] ss:$16 sps:$4 sm:$0xff]   ;;  %v2831_v54 = vld [vmem:[#allocation2 + $0x1ac] ss:$16 sps:$4 sm:$0xff]  }
  0x51   :  { %1370 = vmatprep.subr.bf16.mxu1 %v2737_v55  ;;  %v2834_v55 = vld [vmem:[#allocation2 + $0x564] ss:$16 sps:$4 sm:$0xff]  }
  0x53   :  { %1328 = vmatpush2.bf16.msra.mxu0 %v2739_v56  ;;  %v2829_v56 = vld [vmem:[#allocation2 + $0x1a8] ss:$16 sps:$4 sm:$0xff]  }
  0x54   :  { %1371 = vmatpush2.bf16.msra.mxu1 %v2740_v57  ;;  %1329 = vmatprep.subr.bf16.mxu0 %v2741_v58  ;;  %v2832_v57 = vld [vmem:[#allocation2 + $0x560] ss:$16 sps:$4 sm:$0xff]   ;;  %v2837_v58 = vld [vmem:[#allocation2 + $0x18c] ss:$16 sps:$4 sm:$0xff]  }
  0x55   :  { %1372 = vmatprep.subr.bf16.mxu1 %v2743_v59  ;;  %v2840_v59 = vld [vmem:[#allocation2 + $0x544] ss:$16 sps:$4 sm:$0xff]  }
  0x57   :  { %1330 = vmatpush2.bf16.msra.mxu0 %v2745_v60  ;;  %v2835_v60 = vld [vmem:[#allocation2 + $0x188] ss:$16 sps:$4 sm:$0xff]  }
  0x58   :  { %1373 = vmatpush2.bf16.msra.mxu1 %v2746_v61  ;;  %1331 = vmatprep.subr.bf16.mxu0 %v2747_v62  ;;  %v2838_v61 = vld [vmem:[#allocation2 + $0x540] ss:$16 sps:$4 sm:$0xff]   ;;  %v2843_v62 = vld [vmem:[#allocation2 + $0x16c] ss:$16 sps:$4 sm:$0xff]  }
  0x59   :  { %1374 = vmatprep.subr.bf16.mxu1 %v2749_v63  ;;  %v2846_v63 = vld [vmem:[#allocation2 + $0x524] ss:$16 sps:$4 sm:$0xff]  }
  0x5b   :  { %1332 = vmatpush2.bf16.msra.mxu0 %v2751_v0  ;;  %v2841_v0 = vld [vmem:[#allocation2 + $0x168] ss:$16 sps:$4 sm:$0xff]  }
  0x5c   :  { %1375 = vmatpush2.bf16.msra.mxu1 %v2752_v1  ;;  %1387 = vmatprep.subr.bf16.mxu0 %v2761_v2  ;;  %v2844_v1 = vld [vmem:[#allocation2 + $0x520] ss:$16 sps:$4 sm:$0xff]   ;;  %v2849_v2 = vld [vmem:[#allocation2 + $0x14c] ss:$16 sps:$4 sm:$0xff]  }
  0x5d   :  { %1444 = vmatprep.subr.bf16.mxu1 %v2764_v3  ;;  %v2852_v3 = vld [vmem:[#allocation2 + $0x504] ss:$16 sps:$4 sm:$0xff]  }
  0x5e   :  { %1334 = vmatmul.mubr.bf16.vlgmr.msra.gmra.mxu0 %v3211_v4 }
  0x5f   :  { %1377 = vmatmul.mubr.bf16.vlgmr.msra.gmra.mxu1 %v3216_v5  ;;  %1388 = vmatpush1.bf16.msra.mxu0 %v2759_v6  ;;  %v2847_v6 = vld [vmem:[#allocation2 + $0x148] ss:$16 sps:$4 sm:$0xff]  }
  0x60   :  { %1445 = vmatpush1.bf16.msra.mxu1 %v2762_v7  ;;  %1389 = vmatprep.subr.bf16.mxu0 %v2767_v8  ;;  %v2850_v7 = vld [vmem:[#allocation2 + $0x500] ss:$16 sps:$4 sm:$0xff]   ;;  %v2858_v8 = vld [vmem:[#allocation2 + $0x12c] ss:$16 sps:$4 sm:$0xff]  }
  0x61   :  { %1462 = vmatprep.mubr.bf16.mxu1 %v3145_v11  ;;  %1473 = vmatprep.subr.bf16.mxu1 %v2770_v9  ;;  %v2861_v9 = vld [vmem:[#allocation2 + $0x2ec] ss:$16 sps:$4 sm:$0xff]  }
  0x62   :  { %1419 = vmatprep.mubr.bf16.mxu0 %v3232_v33 }
  0x63   :  { %1390 = vmatpush1.bf16.msra.mxu0 %v2765_v10  ;;  %v3238_v10 = vld [vmem:[%s3326_s0 + $0x10] ss:$28 sps:$4 sm:$0xff]  }
  0x64   :  { %1391 = vmatprep.subr.bf16.mxu0 %v2773_v12  ;;  %v2856_v12 = vld [vmem:[#allocation2 + $0x128] ss:$16 sps:$4 sm:$0xff]  }
  0x67   :  { %2544 = vmatmul.mubr.msk.bf16.vlgmr.msra.gmra.mxu1 %vm1297_vm0, %v3224_v14  ;;  %1392 = vmatpush1.bf16.msra.mxu0 %v2771_v15  ;;  %v2864_v15 = vld [vmem:[#allocation2 + $0x10c] ss:$16 sps:$4 sm:$0xff]  }
  0x68   :  { %1474 = vmatpush1.bf16.msra.mxu1 %v2768_v13  ;;  %1393 = vmatprep.subr.bf16.mxu0 %v2780_v17  ;;  %v2859_v13 = vld [vmem:[#allocation2 + $0x2e8] ss:$16 sps:$4 sm:$0xff]  }
  0x69   :  { %1475 = vmatprep.subr.bf16.mxu1 %v2777_v16  ;;  %1505 = vmatprep.mubr.bf16.mxu1 %v3199_v49  ;;  %v2825_v49 = vld [vmem:[#allocation2 + $0x1cc] ss:$16 sps:$4 sm:$0xff]   ;;  %v2862_v17 = vld [vmem:[#allocation2 + $0x108] ss:$16 sps:$4 sm:$0xff]  }
  0x6a   :  { %v2867_v16 = vld [vmem:[#allocation2 + $0x2cc] ss:$16 sps:$4 sm:$0xff]  }
  0x6b   :  { %1394 = vmatpush1.bf16.msra.mxu0 %v2778_v19  ;;  %v2870_v19 = vld [vmem:[#allocation2 + $0x4ec] ss:$16 sps:$4 sm:$0xff]  }
  0x6c   :  { %1476 = vmatpush1.bf16.msra.mxu1 %v2775_v18  ;;  %1395 = vmatprep.subr.bf16.mxu0 %v2786_v21  ;;  %v2865_v18 = vld [vmem:[#allocation2 + $0x2c8] ss:$16 sps:$4 sm:$0xff]  }
  0x6d   :  { %1477 = vmatprep.subr.bf16.mxu1 %v2783_v20  ;;  %v2873_v20 = vld [vmem:[#allocation2 + $0x2ac] ss:$16 sps:$4 sm:$0xff]   ;;  %v2868_v21 = vld [vmem:[#allocation2 + $0x4e8] ss:$16 sps:$4 sm:$0xff]  }
  0x6f   :  { %1396 = vmatpush1.bf16.msra.mxu0 %v2784_v23  ;;  %v2876_v23 = vld [vmem:[#allocation2 + $0x4cc] ss:$16 sps:$4 sm:$0xff]  }
  0x70   :  { %1478 = vmatpush1.bf16.msra.mxu1 %v2781_v22  ;;  %1397 = vmatprep.subr.bf16.mxu0 %v2792_v25  ;;  %v2871_v22 = vld [vmem:[#allocation2 + $0x2a8] ss:$16 sps:$4 sm:$0xff]  }
  0x71   :  { %1479 = vmatprep.subr.bf16.mxu1 %v2789_v24  ;;  %v2879_v24 = vld [vmem:[#allocation2 + $0x28c] ss:$16 sps:$4 sm:$0xff]   ;;  %v2874_v25 = vld [vmem:[#allocation2 + $0x4c8] ss:$16 sps:$4 sm:$0xff]  }
  0x73   :  { %1398 = vmatpush1.bf16.msra.mxu0 %v2790_v27  ;;  %v2882_v27 = vld [vmem:[#allocation2 + $0x4ac] ss:$16 sps:$4 sm:$0xff]  }
  0x74   :  { %1480 = vmatpush1.bf16.msra.mxu1 %v2787_v26  ;;  %1399 = vmatprep.subr.bf16.mxu0 %v2798_v29  ;;  %v2877_v26 = vld [vmem:[#allocation2 + $0x288] ss:$16 sps:$4 sm:$0xff]  }
  0x75   :  { %1481 = vmatprep.subr.bf16.mxu1 %v2795_v28  ;;  %v2885_v28 = vld [vmem:[#allocation2 + $0x26c] ss:$16 sps:$4 sm:$0xff]   ;;  %v2880_v29 = vld [vmem:[#allocation2 + $0x4a8] ss:$16 sps:$4 sm:$0xff]  }
  0x77   :  { %1400 = vmatpush1.bf16.msra.mxu0 %v2796_v31  ;;  %v2891_v31 = vld [vmem:[#allocation2 + $0x24c] ss:$16 sps:$4 sm:$0xff]  }
  0x78   :  { %1482 = vmatpush1.bf16.msra.mxu1 %v2793_v30  ;;  %1401 = vmatprep.subr.bf16.mxu0 %v2804_v34  ;;  %v2883_v30 = vld [vmem:[#allocation2 + $0x268] ss:$16 sps:$4 sm:$0xff]   ;;  %v2894_v34 = vld [vmem:[#allocation2 + $0x46c] ss:$16 sps:$4 sm:$0xff]  }
  0x79   :  { %1483 = vmatprep.subr.bf16.mxu1 %v2801_v32  ;;  %v2886_v32 = vld [vmem:[#allocation2 + $0x488] ss:$16 sps:$4 sm:$0xff]  }
  0x7b   :  { %1402 = vmatpush1.bf16.msra.mxu0 %v2802_v36  ;;  %v2892_v36 = vld [vmem:[#allocation2 + $0x468] ss:$16 sps:$4 sm:$0xff]  }
  0x7c   :  { %1484 = vmatpush1.bf16.msra.mxu1 %v2799_v35  ;;  %1403 = vmatprep.subr.bf16.mxu0 %v2810_v38  ;;  %v2897_v35 = vld [vmem:[#allocation2 + $0x22c] ss:$16 sps:$4 sm:$0xff]  }
  0x7d   :  { %1485 = vmatprep.subr.bf16.mxu1 %v2807_v37  ;;  %v2895_v37 = vld [vmem:[#allocation2 + $0x228] ss:$16 sps:$4 sm:$0xff]   ;;  %v2900_v38 = vld [vmem:[#allocation2 + $0x44c] ss:$16 sps:$4 sm:$0xff]  }
  0x7f   :  { %1404 = vmatpush2.bf16.msra.mxu0 %v2808_v40  ;;  %v2901_v40 = vld [vmem:[#allocation2 + $0x208] ss:$16 sps:$4 sm:$0xff]  }
  0x80   :  { %1486 = vmatpush1.bf16.msra.mxu1 %v2805_v39  ;;  %1405 = vmatprep.subr.bf16.mxu0 %v2816_v42  ;;  %v2898_v39 = vld [vmem:[#allocation2 + $0x448] ss:$16 sps:$4 sm:$0xff]   ;;  %v2909_v42 = vld [vmem:[#allocation2 + $0x3ec] ss:$16 sps:$4 sm:$0xff]  }
  0x81   :  { %1487 = vmatprep.subr.bf16.mxu1 %v2813_v41  ;;  %v2906_v41 = vld [vmem:[#allocation2 + $0x42c] ss:$16 sps:$4 sm:$0xff]  }
  0x83   :  { %1406 = vmatpush2.bf16.msra.mxu0 %v2814_v44  ;;  %v2907_v44 = vld [vmem:[#allocation2 + $0x3e8] ss:$16 sps:$4 sm:$0xff]  }
  0x84   :  { %1488 = vmatpush1.bf16.msra.mxu1 %v2811_v43  ;;  %1407 = vmatprep.subr.bf16.mxu0 %v2822_v46  ;;  %v2904_v43 = vld [vmem:[#allocation2 + $0x428] ss:$16 sps:$4 sm:$0xff]   ;;  %v2915_v46 = vld [vmem:[#allocation2 + $0x3cc] ss:$16 sps:$4 sm:$0xff]  }
  0x85   :  { %1489 = vmatprep.subr.bf16.mxu1 %v2819_v45  ;;  %v2912_v45 = vld [vmem:[#allocation2 + $0x40c] ss:$16 sps:$4 sm:$0xff]  }
  0x87   :  { %1408 = vmatpush2.bf16.msra.mxu0 %v2820_v48  ;;  %v2913_v48 = vld [vmem:[#allocation2 + $0x3c8] ss:$16 sps:$4 sm:$0xff]  }
  0x88   :  { %1490 = vmatpush2.bf16.msra.mxu1 %v2817_v47  ;;  %1409 = vmatprep.subr.bf16.mxu0 %v2828_v50  ;;  %v2910_v47 = vld [vmem:[#allocation2 + $0x408] ss:$16 sps:$4 sm:$0xff]   ;;  %v2921_v50 = vld [vmem:[#allocation2 + $0x3ac] ss:$16 sps:$4 sm:$0xff]  }
  0x89   :  { %1491 = vmatprep.subr.bf16.mxu1 %v2825_v49  ;;  %v2918_v49 = vld [vmem:[#allocation2 + $0x5ec] ss:$16 sps:$4 sm:$0xff]  }
  0x8b   :  { %1410 = vmatpush2.bf16.msra.mxu0 %v2826_v53  ;;  %v2919_v53 = vld [vmem:[#allocation2 + $0x3a8] ss:$16 sps:$4 sm:$0xff]  }
  0x8c   :  { %1492 = vmatpush2.bf16.msra.mxu1 %v2823_v52  ;;  %1411 = vmatprep.subr.bf16.mxu0 %v2834_v55  ;;  %v2916_v52 = vld [vmem:[#allocation2 + $0x5e8] ss:$16 sps:$4 sm:$0xff]   ;;  %v2927_v55 = vld [vmem:[#allocation2 + $0x38c] ss:$16 sps:$4 sm:$0xff]  }
  0x8d   :  { %1493 = vmatprep.subr.bf16.mxu1 %v2831_v54  ;;  %v2924_v54 = vld [vmem:[#allocation2 + $0x5cc] ss:$16 sps:$4 sm:$0xff]  }
  0x8f   :  { %1412 = vmatpush2.bf16.msra.mxu0 %v2832_v57  ;;  %v2925_v57 = vld [vmem:[#allocation2 + $0x388] ss:$16 sps:$4 sm:$0xff]  }
  0x90   :  { %1494 = vmatpush2.bf16.msra.mxu1 %v2829_v56  ;;  %1413 = vmatprep.subr.bf16.mxu0 %v2840_v59  ;;  %v2922_v56 = vld [vmem:[#allocation2 + $0x5c8] ss:$16 sps:$4 sm:$0xff]   ;;  %v2933_v59 = vld [vmem:[#allocation2 + $0x36c] ss:$16 sps:$4 sm:$0xff]  }
  0x91   :  { %1495 = vmatprep.subr.bf16.mxu1 %v2837_v58  ;;  %v2930_v58 = vld [vmem:[#allocation2 + $0x5ac] ss:$16 sps:$4 sm:$0xff]  }
  0x93   :  { %1414 = vmatpush2.bf16.msra.mxu0 %v2838_v61  ;;  %v2931_v61 = vld [vmem:[#allocation2 + $0x368] ss:$16 sps:$4 sm:$0xff]  }
  0x94   :  { %1496 = vmatpush2.bf16.msra.mxu1 %v2835_v60  ;;  %1415 = vmatprep.subr.bf16.mxu0 %v2846_v63  ;;  %v2928_v60 = vld [vmem:[#allocation2 + $0x5a8] ss:$16 sps:$4 sm:$0xff]   ;;  %v2939_v63 = vld [vmem:[#allocation2 + $0x34c] ss:$16 sps:$4 sm:$0xff]  }
  0x95   :  { %1497 = vmatprep.subr.bf16.mxu1 %v2843_v62  ;;  %v2936_v62 = vld [vmem:[#allocation2 + $0x58c] ss:$16 sps:$4 sm:$0xff]  }
  0x97   :  { %1416 = vmatpush2.bf16.msra.mxu0 %v2844_v1  ;;  %v2937_v1 = vld [vmem:[#allocation2 + $0x348] ss:$16 sps:$4 sm:$0xff]  }
  0x98   :  { %1498 = vmatpush2.bf16.msra.mxu1 %v2841_v0  ;;  %1417 = vmatprep.subr.bf16.mxu0 %v2852_v3  ;;  %v2934_v0 = vld [vmem:[#allocation2 + $0x588] ss:$16 sps:$4 sm:$0xff]   ;;  %v2945_v3 = vld [vmem:[#allocation2 + $0x32c] ss:$16 sps:$4 sm:$0xff]  }
  0x99   :  { %1499 = vmatprep.subr.bf16.mxu1 %v2849_v2  ;;  %v2942_v2 = vld [vmem:[#allocation2 + $0x56c] ss:$16 sps:$4 sm:$0xff]  }
  0x9b   :  { %1418 = vmatpush2.bf16.msra.mxu0 %v2850_v7  ;;  %v2943_v7 = vld [vmem:[#allocation2 + $0x328] ss:$16 sps:$4 sm:$0xff]  }
  0x9c   :  { %1500 = vmatpush2.bf16.msra.mxu1 %v2847_v6  ;;  %1516 = vmatprep.subr.bf16.mxu0 %v2861_v9  ;;  %v2940_v6 = vld [vmem:[#allocation2 + $0x568] ss:$16 sps:$4 sm:$0xff]   ;;  %v2951_v9 = vld [vmem:[#allocation2 + $0x30c] ss:$16 sps:$4 sm:$0xff]  }
  0x9d   :  { %1501 = vmatprep.subr.bf16.mxu1 %v2858_v8  ;;  %v2948_v8 = vld [vmem:[#allocation2 + $0x54c] ss:$16 sps:$4 sm:$0xff]  }
  0x9e   :  { %1420 = vmatmul.mubr.bf16.vlgmr.msra.gmra.mxu0 %v3238_v10 }
  0x9f   :  { %1517 = vmatpush1.bf16.msra.mxu0 %v2859_v13  ;;  %1548 = vmatprep.mubr.bf16.mxu0 %v3204_v51  ;;  %v2888_v51 = vld [vmem:[#allocation2 + $0x48c] ss:$16 sps:$4 sm:$0xff]   ;;  %v2949_v13 = vld [vmem:[#allocation2 + $0x308] ss:$16 sps:$4 sm:$0xff]  }
  0xa0   :  { %1502 = vmatpush2.bf16.msra.mxu1 %v2856_v12  ;;  %1518 = vmatprep.subr.bf16.mxu0 %v2867_v16  ;;  %v2946_v12 = vld [vmem:[#allocation2 + $0x548] ss:$16 sps:$4 sm:$0xff]   ;;  %v2963_v16 = vld [vmem:[#allocation5 + $0x74] ss:$8 sps:$4 sm:$0xff]  }
  0xa1   :  { %1503 = vmatprep.subr.bf16.mxu1 %v2864_v15  ;;  %v2954_v15 = vld [vmem:[#allocation2 + $0x52c] ss:$16 sps:$4 sm:$0xff]  }
  0xa3   :  { %1519 = vmatpush1.bf16.msra.mxu0 %v2865_v18  ;;  %v2961_v18 = vld [vmem:[#allocation5 + $0x70] ss:$8 sps:$4 sm:$0xff]  }
  0xa4   :  { %1504 = vmatpush2.bf16.msra.mxu1 %v2862_v17  ;;  %1520 = vmatprep.subr.bf16.mxu0 %v2873_v20  ;;  %v2952_v17 = vld [vmem:[#allocation2 + $0x528] ss:$16 sps:$4 sm:$0xff]   ;;  %v2966_v20 = vld [vmem:[#allocation5 + $0x64] ss:$8 sps:$4 sm:$0xff]  }
  0xa5   :  { %1559 = vmatprep.subr.bf16.mxu1 %v2870_v19  ;;  %v2957_v19 = vld [vmem:[#allocation2 + $0x50c] ss:$16 sps:$4 sm:$0xff]  }
  0xa7   :  { %1506 = vmatmul.mubr.bf16.vlgmr.msra.gmra.mxu1 %v3211_v4  ;;  %1521 = vmatpush1.bf16.msra.mxu0 %v2871_v22  ;;  %v2889_v4 = vld [vmem:[#allocation2 + $0x248] ss:$16 sps:$4 sm:$0xff]  }
  0xa8   :  { %1560 = vmatpush1.bf16.msra.mxu1 %v2868_v21  ;;  %1522 = vmatprep.subr.bf16.mxu0 %v2879_v24  ;;  %v2955_v21 = vld [vmem:[#allocation2 + $0x508] ss:$16 sps:$4 sm:$0xff]   ;;  %v2969_v24 = vld [vmem:[#allocation5 + $0x54] ss:$8 sps:$4 sm:$0xff]  }
  0xa9   :  { %1561 = vmatprep.subr.bf16.mxu1 %v2876_v23  ;;  %1591 = vmatprep.mubr.bf16.mxu1 %v3232_v33  ;;  %v2903_v33 = vld [vmem:[#allocation2 + $0x20c] ss:$16 sps:$4 sm:$0xff]   ;;  %v2964_v22 = vld [vmem:[#allocation5 + $0x60] ss:$8 sps:$4 sm:$0xff]  }
  0xaa   :  { %v2960_v23 = vld [vmem:[#allocation2 + $0x60c] ss:$16 sps:$4 sm:$0xff]  }
  0xab   :  { %1523 = vmatpush1.bf16.msra.mxu0 %v2877_v26  ;;  %v2967_v26 = vld [vmem:[#allocation5 + $0x50] ss:$8 sps:$4 sm:$0xff]  }
  0xac   :  { %1562 = vmatpush1.bf16.msra.mxu1 %v2874_v25  ;;  %1524 = vmatprep.subr.bf16.mxu0 %v2885_v28  ;;  %v2958_v25 = vld [vmem:[#allocation2 + $0x608] ss:$16 sps:$4 sm:$0xff]   ;;  %v2975_v28 = vld [vmem:[#allocation5 + $0x34] ss:$8 sps:$4 sm:$0xff]  }
  0xad   :  { %1563 = vmatprep.subr.bf16.mxu1 %v2882_v27  ;;  %v2972_v27 = vld [vmem:[#allocation5 + $0x44] ss:$8 sps:$4 sm:$0xff]  }
  0xaf   :  { %1525 = vmatpush1.bf16.msra.mxu0 %v2883_v30  ;;  %v2978_v30 = vld [vmem:[#allocation5 + $0x24] ss:$8 sps:$4 sm:$0xff]  }
  0xb0   :  { %1564 = vmatpush1.bf16.msra.mxu1 %v2880_v29  ;;  %1526 = vmatprep.subr.bf16.mxu0 %v2891_v31  ;;  %v2973_v29 = vld [vmem:[#allocation5 + $0x30] ss:$8 sps:$4 sm:$0xff]   ;;  %v3011_v31 = vld [vmem:[#allocation5 + $0x174] ss:$8 sps:$4 sm:$0xff]  }
  0xb1   :  { %1565 = vmatprep.subr.bf16.mxu1 %v2888_v51  ;;  %v3009_v51 = vld [vmem:[#allocation5 + $0x170] ss:$8 sps:$4 sm:$0xff]  }
  0xb3   :  { %1527 = vmatpush1.bf16.msra.mxu0 %v2889_v4  ;;  %v2976_v4 = vld [vmem:[#allocation5 + $0x20] ss:$8 sps:$4 sm:$0xff]  }
  0xb4   :  { %1566 = vmatpush1.bf16.msra.mxu1 %v2886_v32  ;;  %1528 = vmatprep.subr.bf16.mxu0 %v2897_v35  ;;  %v3014_v32 = vld [vmem:[#allocation5 + $0x164] ss:$8 sps:$4 sm:$0xff]   ;;  %v2979_v35 = vld [vmem:[#allocation5 + $0x10] ss:$8 sps:$4 sm:$0xff]  }
  0xb5   :  { %1567 = vmatprep.subr.bf16.mxu1 %v2894_v34  ;;  %v3017_v34 = vld [vmem:[#allocation5 + $0x154] ss:$8 sps:$4 sm:$0xff]  }
  0xb7   :  { %1529 = vmatpush1.bf16.msra.mxu0 %v2895_v37  ;;  %v3015_v37 = vld [vmem:[#allocation5 + $0x150] ss:$8 sps:$4 sm:$0xff]  }
  0xb8   :  { %1568 = vmatpush1.bf16.msra.mxu1 %v2892_v36  ;;  %1530 = vmatprep.subr.bf16.mxu0 %v2903_v33  ;;  %v2984_v36 = vld [vmem:[#allocation5 + $0x4] ss:$8 sps:$4 sm:$0xff]   ;;  %v2987_v33 = vld [vmem:[#allocation5 + $0xf4] ss:$8 sps:$4 sm:$0xff]  }
  0xb9   :  { %1569 = vmatprep.subr.bf16.mxu1 %v2900_v38  ;;  %v2982_v38 = vld [vmem:[#allocation5] ss:$8 sps:$4 sm:$0xff]  }
  0xbb   :  { %1531 = vmatpush1.bf16.msra.mxu0 %v2901_v40  ;;  %v3023_v40 = vld [vmem:[#allocation5 + $0x134] ss:$8 sps:$4 sm:$0xff]  }
  0xbc   :  { %1570 = vmatpush1.bf16.msra.mxu1 %v2898_v39  ;;  %1532 = vmatprep.subr.bf16.mxu0 %v2909_v42  ;;  %v3018_v39 = vld [vmem:[#allocation5 + $0x140] ss:$8 sps:$4 sm:$0xff]   ;;  %v2990_v42 = vld [vmem:[#allocation5 + $0xe4] ss:$8 sps:$4 sm:$0xff]  }
  0xbd   :  { %1571 = vmatprep.subr.bf16.mxu1 %v2906_v41  ;;  %v2985_v41 = vld [vmem:[#allocation5 + $0xf0] ss:$8 sps:$4 sm:$0xff]  }
  0xbf   :  { %1533 = vmatpush2.bf16.msra.mxu0 %v2907_v44  ;;  %v3026_v44 = vld [vmem:[#allocation5 + $0x124] ss:$8 sps:$4 sm:$0xff]  }
  0xc0   :  { %1572 = vmatpush1.bf16.msra.mxu1 %v2904_v43  ;;  %1534 = vmatprep.subr.bf16.mxu0 %v2915_v46  ;;  %v3021_v43 = vld [vmem:[#allocation5 + $0x130] ss:$8 sps:$4 sm:$0xff]   ;;  %v2993_v46 = vld [vmem:[#allocation5 + $0xd4] ss:$8 sps:$4 sm:$0xff]  }
  0xc1   :  { %1573 = vmatprep.subr.bf16.mxu1 %v2912_v45  ;;  %v2988_v45 = vld [vmem:[#allocation5 + $0xe0] ss:$8 sps:$4 sm:$0xff]  }
  0xc3   :  { %1535 = vmatpush2.bf16.msra.mxu0 %v2913_v48  ;;  %v3029_v48 = vld [vmem:[#allocation5 + $0x114] ss:$8 sps:$4 sm:$0xff]  }
  0xc4   :  { %1574 = vmatpush1.bf16.msra.mxu1 %v2910_v47  ;;  %1536 = vmatprep.subr.bf16.mxu0 %v2921_v50  ;;  %v3024_v47 = vld [vmem:[#allocation5 + $0x120] ss:$8 sps:$4 sm:$0xff]   ;;  %v2996_v50 = vld [vmem:[#allocation5 + $0xc4] ss:$8 sps:$4 sm:$0xff]  }
  0xc5   :  { %1575 = vmatprep.subr.bf16.mxu1 %v2918_v49  ;;  %v2991_v49 = vld [vmem:[#allocation5 + $0xd0] ss:$8 sps:$4 sm:$0xff]  }
  0xc7   :  { %1537 = vmatpush2.bf16.msra.mxu0 %v2919_v53  ;;  %v3032_v53 = vld [vmem:[#allocation5 + $0x104] ss:$8 sps:$4 sm:$0xff]  }
  0xc8   :  { %1576 = vmatpush2.bf16.msra.mxu1 %v2916_v52  ;;  %1538 = vmatprep.subr.bf16.mxu0 %v2927_v55  ;;  %v3027_v52 = vld [vmem:[#allocation5 + $0x110] ss:$8 sps:$4 sm:$0xff]   ;;  %v2999_v55 = vld [vmem:[#allocation5 + $0xb4] ss:$8 sps:$4 sm:$0xff]  }
  0xc9   :  { %1577 = vmatprep.subr.bf16.mxu1 %v2924_v54  ;;  %v2994_v54 = vld [vmem:[#allocation5 + $0xc0] ss:$8 sps:$4 sm:$0xff]  }
  0xcb   :  { %1539 = vmatpush2.bf16.msra.mxu0 %v2925_v57  ;;  %v3035_v57 = vld [vmem:[#allocation5 + $0x1f4] ss:$8 sps:$4 sm:$0xff]  }
  0xcc   :  { %1578 = vmatpush2.bf16.msra.mxu1 %v2922_v56  ;;  %1540 = vmatprep.subr.bf16.mxu0 %v2933_v59  ;;  %v3030_v56 = vld [vmem:[#allocation5 + $0x100] ss:$8 sps:$4 sm:$0xff]   ;;  %v3002_v59 = vld [vmem:[#allocation5 + $0xa4] ss:$8 sps:$4 sm:$0xff]  }
  0xcd   :  { %1579 = vmatprep.subr.bf16.mxu1 %v2930_v58  ;;  %v2997_v58 = vld [vmem:[#allocation5 + $0xb0] ss:$8 sps:$4 sm:$0xff]  }
  0xcf   :  { %1541 = vmatpush2.bf16.msra.mxu0 %v2931_v61  ;;  %v3000_v61 = vld [vmem:[#allocation5 + $0xa0] ss:$8 sps:$4 sm:$0xff]  }
  0xd0   :  { %1580 = vmatpush2.bf16.msra.mxu1 %v2928_v60  ;;  %1542 = vmatprep.subr.bf16.mxu0 %v2939_v63  ;;  %v3033_v60 = vld [vmem:[#allocation5 + $0x1f0] ss:$8 sps:$4 sm:$0xff]  }
  0xd1   :  { %1581 = vmatprep.subr.bf16.mxu1 %v2936_v62  ;;  %v3005_v62 = vld [vmem:[#allocation5 + $0x94] ss:$8 sps:$4 sm:$0xff]   ;;  %v3003_v63 = vld [vmem:[#allocation5 + $0x90] ss:$8 sps:$4 sm:$0xff]  }
  0xd3   :  { %1543 = vmatpush2.bf16.msra.mxu0 %v2937_v1  ;;  %v3006_v1 = vld [vmem:[#allocation5 + $0x80] ss:$8 sps:$4 sm:$0xff]  }
  0xd4   :  { %1582 = vmatpush2.bf16.msra.mxu1 %v2934_v0  ;;  %1544 = vmatprep.subr.bf16.mxu0 %v2945_v3  ;;  %v3008_v0 = vld [vmem:[#allocation5 + $0x84] ss:$8 sps:$4 sm:$0xff]   ;;  %v3036_v3 = vld [vmem:[#allocation5 + $0x1e0] ss:$8 sps:$4 sm:$0xff]  }
  0xd5   :  { %1583 = vmatprep.subr.bf16.mxu1 %v2942_v2  ;;  %v3038_v2 = vld [vmem:[#allocation5 + $0x1e4] ss:$8 sps:$4 sm:$0xff]  }
  0xd7   :  { %1545 = vmatpush2.bf16.msra.mxu0 %v2943_v7  ;;  %v3039_v7 = vld [vmem:[#allocation5 + $0x1d0] ss:$8 sps:$4 sm:$0xff]  }
  0xd8   :  { %1584 = vmatpush2.bf16.msra.mxu1 %v2940_v6  ;;  %1546 = vmatprep.subr.bf16.mxu0 %v2951_v9  ;;  %v3041_v6 = vld [vmem:[#allocation5 + $0x1d4] ss:$8 sps:$4 sm:$0xff]   ;;  %v3042_v9 = vld [vmem:[#allocation5 + $0x1c0] ss:$8 sps:$4 sm:$0xff]  }
  0xd9   :  { %1585 = vmatprep.subr.bf16.mxu1 %v2948_v8  ;;  %v3044_v8 = vld [vmem:[#allocation5 + $0x1c4] ss:$8 sps:$4 sm:$0xff]  }
  0xdb   :  { %1547 = vmatpush2.bf16.msra.mxu0 %v2949_v13  ;;  %v3045_v13 = vld [vmem:[#allocation5 + $0x1b0] ss:$8 sps:$4 sm:$0xff]  }
  0xdc   :  { %1586 = vmatpush2.bf16.msra.mxu1 %v2946_v12  ;;  %2053 = vmatprep.subr.bf16.mxu0 %v2963_v16  ;;  %v3047_v12 = vld [vmem:[#allocation5 + $0x1b4] ss:$8 sps:$4 sm:$0xff]   ;;  %v3048_v16 = vld [vmem:[#allocation5 + $0x1a0] ss:$8 sps:$4 sm:$0xff]  }
  0xdd   :  { %1587 = vmatprep.subr.bf16.mxu1 %v2954_v15  ;;  %v3050_v15 = vld [vmem:[#allocation5 + $0x1a4] ss:$8 sps:$4 sm:$0xff]  }
  0xde   :  { %1549 = vmatmul.mubr.bf16.vlgmr.msra.gmra.mxu0 %v3216_v5  ;;  %v2970_v5 = vld [vmem:[#allocation5 + $0x40] ss:$8 sps:$4 sm:$0xff]  }
  0xdf   :  { %2054 = vmatpush1.bf16.msra.mxu0 %v2961_v18  ;;  %v3051_v18 = vld [vmem:[#allocation5 + $0x190] ss:$8 sps:$4 sm:$0xff]  }
  0xe0   :  { %1588 = vmatpush2.bf16.msra.mxu1 %v2952_v17  ;;  %2055 = vmatprep.subr.bf16.mxu0 %v2966_v20  ;;  %v3053_v17 = vld [vmem:[#allocation5 + $0x194] ss:$8 sps:$4 sm:$0xff]   ;;  %v3054_v20 = vld [vmem:[#allocation5 + $0x180] ss:$8 sps:$4 sm:$0xff]  }
  0xe1   :  { %1589 = vmatprep.subr.bf16.mxu1 %v2957_v19  ;;  %v3056_v19 = vld [vmem:[#allocation5 + $0x184] ss:$8 sps:$4 sm:$0xff]  }
  0xe3   :  { %2056 = vmatpush1.bf16.msra.mxu0 %v2964_v22  ;;  %v262_v22 = vlaneseq }
  0xe4   :  { %1590 = vmatpush2.bf16.msra.mxu1 %v2955_v21  ;;  %2057 = vmatprep.subr.bf16.mxu0 %v2969_v24 }
  0xe5   :  { %1616 = vmatprep.subr.bf16.mxu1 %v2960_v23  ;;  %v3249_v24 = vshrl.u32 %v262_v22, 7 }
  0xe7   :  { %1592 = vmatmul.mubr.bf16.vlgmr.msra.gmra.mxu1 %v3238_v10  ;;  %2058 = vmatpush1.bf16.msra.mxu0 %v2967_v26  ;;  %v2981_v10 = vld [vmem:[#allocation5 + $0x14] ss:$8 sps:$4 sm:$0xff]  }
  0xe8   :  { %1617 = vmatpush1.bf16.msra.mxu1 %v2958_v25  ;;  %1634 = vmatprep.mubr.bf16.mxu1 %v3145_v11  ;;  %v3012_v11 = vld [vmem:[#allocation5 + $0x160] ss:$8 sps:$4 sm:$0xff]  }
  0xe9   :  { %2059 = vmatprep.subr.bf16.mxu0 %v2972_v27  ;;  %2096 = vmatprep.subr.bf16.mxu1 %v3011_v31  ;;  %v268_v27 = vsub.s32 1, %v3249_v24 }
  0xeb   :  { %2060 = vmatpush1.bf16.msra.mxu0 %v2970_v5  ;;  %v264_v5 = vsub.s32 0, %v3249_v24 }
  0xec   :  { %2061 = vmatprep.subr.bf16.mxu0 %v2975_v28 }
  0xef   :  { %2545 = vmatmul.mubr.msk.bf16.vlgmr.msra.gmra.mxu1 %vm1297_vm0, %v3224_v14  ;;  %2062 = vmatpush1.bf16.msra.mxu0 %v2973_v29  ;;  %v3020_v14 = vld [vmem:[#allocation5 + $0x144] ss:$8 sps:$4 sm:$0xff]   ;;  %v260_v29 = vld [vmem:[%s3328_s2] sm:$0xf] }
  0xf0   :  { %2063 = vmatprep.subr.bf16.mxu0 %v2978_v30  ;;  %2097 = vmatpush1.bf16.msra.mxu1 %v3009_v51  ;;  %v269_v51 = vrot.slane %v260_v29, %v268_v27  ;;  %v265_v31 = vrot.slane %v260_v29, %v264_v5 }
  0xf1   :  { %2098 = vmatprep.subr.bf16.mxu1 %v3014_v32 }
  0xf3   :  { %2064 = vmatpush1.bf16.msra.mxu0 %v2976_v4 }
  0xf4   :  { %2065 = vmatprep.subr.bf16.mxu0 %v2981_v10  ;;  %2099 = vmatpush1.bf16.msra.mxu1 %v3012_v11 }
  0xf5   :  { %2100 = vmatprep.subr.bf16.mxu1 %v3017_v34 }
  0xf7   :  { %2066 = vmatpush1.bf16.msra.mxu0 %v2979_v35 }
  0xf8   :  { %2067 = vmatprep.subr.bf16.mxu0 %v2984_v36  ;;  %2101 = vmatpush1.bf16.msra.mxu1 %v3015_v37 }
  0xf9   :  { %2102 = vmatprep.subr.bf16.mxu1 %v3020_v14 }
  0xfb   :  { %2068 = vmatpush1.bf16.msra.mxu0 %v2982_v38 }
  0xfc   :  { %2069 = vmatprep.subr.bf16.mxu0 %v2987_v33  ;;  %2103 = vmatpush1.bf16.msra.mxu1 %v3018_v39 }
  0xfd   :  { %2104 = vmatprep.subr.bf16.mxu1 %v3023_v40 }
  0xff   :  { %2070 = vmatpush2.bf16.msra.mxu0 %v2985_v41 }
 0x100   :  { %2071 = vmatprep.subr.bf16.mxu0 %v2990_v42  ;;  %2105 = vmatpush1.bf16.msra.mxu1 %v3021_v43 }
 0x101   :  { %2106 = vmatprep.subr.bf16.mxu1 %v3026_v44 }
 0x103   :  { %2072 = vmatpush2.bf16.msra.mxu0 %v2988_v45 }
 0x104   :  { %2073 = vmatprep.subr.bf16.mxu0 %v2993_v46  ;;  %2107 = vmatpush1.bf16.msra.mxu1 %v3024_v47 }
 0x105   :  { %2108 = vmatprep.subr.bf16.mxu1 %v3029_v48 }
 0x107   :  { %2074 = vmatpush2.bf16.msra.mxu0 %v2991_v49 }
 0x108   :  { %2075 = vmatprep.subr.bf16.mxu0 %v2996_v50  ;;  %2109 = vmatpush1.bf16.msra.mxu1 %v3027_v52 }
 0x109   :  { %2110 = vmatprep.subr.bf16.mxu1 %v3032_v53 }
 0x10b   :  { %2076 = vmatpush2.bf16.msra.mxu0 %v2994_v54 }
 0x10c   :  { %2077 = vmatprep.subr.bf16.mxu0 %v2999_v55  ;;  %2111 = vmatpush1.bf16.msra.mxu1 %v3030_v56 }
 0x10d   :  { %2112 = vmatprep.subr.bf16.mxu1 %v3035_v57 }
 0x10f   :  { %2078 = vmatpush2.bf16.msra.mxu0 %v2997_v58 }
 0x110   :  { %2079 = vmatprep.subr.bf16.mxu0 %v3002_v59  ;;  %2113 = vmatpush2.bf16.msra.mxu1 %v3033_v60 }
 0x111   :  { %2114 = vmatprep.subr.bf16.mxu1 %v3038_v2  ;;  %v276_v2 = vsub.s32 3, %v3249_v24 }
 0x113   :  { %2080 = vmatpush2.bf16.msra.mxu0 %v3000_v61 }
 0x114   :  { %2081 = vmatprep.subr.bf16.mxu0 %v3005_v62  ;;  %2115 = vmatpush2.bf16.msra.mxu1 %v3036_v3  ;;  %v272_v3 = vsub.s32 2, %v3249_v24 }
 0x115   :  { %2116 = vmatprep.subr.bf16.mxu1 %v3041_v6 }
 0x117   :  { %2082 = vmatpush2.bf16.msra.mxu0 %v3003_v63 }
 0x118   :  { %2083 = vmatprep.subr.bf16.mxu0 %v3008_v0  ;;  %2117 = vmatpush2.bf16.msra.mxu1 %v3039_v7 }
 0x119   :  { %2118 = vmatprep.subr.bf16.mxu1 %v3044_v8 }
 0x11b   :  { %2084 = vmatpush2.bf16.msra.mxu0 %v3006_v1 }
 0x11c   :  { %2119 = vmatpush2.bf16.msra.mxu1 %v3042_v9  ;;  %v277_v9 = vrot.slane %v260_v29, %v276_v2 }
 0x11d   :  { %2120 = vmatprep.subr.bf16.mxu1 %v3047_v12  ;;  %v273_v12 = vrot.slane %v260_v29, %v272_v3 }
 0x11e   :  { %v1335_v25 = vpop.f32.mrf.mxu0 }
 0x11f   :  { %v1378_v21 = vpop.f32.mrf.mxu1  ;;  %v1336_v11 = vadd.f32 %v1335_v25, %v265_v31 }
 0x120   :  { %2121 = vmatpush2.bf16.msra.mxu1 %v3045_v13  ;;  %v1337_v28 = vpop.f32.mrf.mxu0 }
 0x121   :  { %2122 = vmatprep.subr.bf16.mxu1 %v3050_v15  ;;  %v1380_v23 = vpop.f32.mrf.mxu1  ;;  %v1338_v10 = vadd.f32 %v1337_v28, %v269_v51  ;;  %v1379_v33 = vadd.f32 %v1378_v21, %v1336_v11 }
 0x122   :  { %v1339_v32 = vpop.f32.mrf.mxu0 }
 0x123   :  { %v1382_v26 = vpop.f32.mrf.mxu1  ;;  %v1340_v35 = vadd.f32 %v1339_v32, %v265_v31  ;;  %v1381_v14 = vadd.f32 %v1380_v23, %v1338_v10 }
 0x124   :  { %2123 = vmatpush2.bf16.msra.mxu1 %v3048_v16  ;;  %v1341_v34 = vpop.f32.mrf.mxu0 }
 0x125   :  { %2124 = vmatprep.subr.bf16.mxu1 %v3053_v17  ;;  %v1384_v30 = vpop.f32.mrf.mxu1  ;;  %v1342_v38 = vadd.f32 %v1341_v34, %v269_v51  ;;  %v1383_v40 = vadd.f32 %v1382_v26, %v1340_v35 }
 0x127   :  { %v1464_v4 = vpop.f32.mrf.mxu1  ;;  %v1385_v45 = vadd.f32 %v1384_v30, %v1342_v38  ;;  %v3059_v38 = vld [vmem:[%s3331_s5 + $0x70] sm:$0xff]  }
 0x128   :  { %2125 = vmatpush2.bf16.msra.mxu1 %v3051_v18 }
 0x129   :  { %2126 = vmatprep.subr.bf16.mxu1 %v3056_v19  ;;  %v1466_v36 = vpop.f32.mrf.mxu1 }
 0x12b   :  { %v1468_v42 = vpop.f32.mrf.mxu1 }
 0x12c   :  { %2127 = vmatpush2.bf16.msra.mxu1 %v3054_v20 }
 0x12d   :  { %v1470_v52 = vpop.f32.mrf.mxu1 }
 0x15e   :  { %v1421_v37 = vpop.f32.mrf.mxu0 }
 0x15f   :  { %v1422_v43 = vadd.f32 %v1421_v37, %v1379_v33  ;;  %v3057_v37 = vld [vmem:[%s3331_s5 + $0x78] sm:$0xff]  }
 0x160   :  { %v1423_v39 = vpop.f32.mrf.mxu0  ;;  %2627 = vmatprep.subr.bf16.mxu0 %v3057_v37 }
 0x161   :  { %v1424_v41 = vadd.f32 %v1423_v39, %v1381_v14  ;;  %v1465_v53 = vadd.f32 %v1464_v4, %v1422_v43  ;;  %v3058_v14 = vld [vmem:[%s3331_s5 + $0x38] sm:$0xff]  }
 0x162   :  { %v1425_v44 = vpop.f32.mrf.mxu0 }
 0x163   :  { %v1426_v46 = vadd.f32 %v1425_v44, %v1383_v40  ;;  %v1467_v48 = vadd.f32 %v1466_v36, %v1424_v41  ;;  %v1645_v58 = vmax.f32 %v1465_v53, 0.0  ;;  %v3061_v44 = vld [vmem:[%s3331_s5 + $0x68] sm:$0xff]   ;;  %v3068_v53 = vld [vmem:[%s3331_s5 + $0x10] sm:$0xff]  }
 0x164   :  { %v1427_v47 = vpop.f32.mrf.mxu0 }
 0x165   :  { %v1469_v49 = vadd.f32 %v1468_v42, %v1426_v46  ;;  %v1428_v50 = vadd.f32 %v1427_v47, %v1385_v45  ;;  %v1646_v56 = vmax.f32 %v1467_v48, 0.0  ;;  %v3060_v42 = vld [vmem:[%s3331_s5 + $0x30] sm:$0xff]   ;;  %v3062_v46 = vld [vmem:[%s3331_s5 + $0x28] sm:$0xff]   ;;  %v3063_v47 = vld [vmem:[%s3331_s5 + $0x60] sm:$0xff]  }
 0x166   :  { %v3064_v48 = vld [vmem:[%s3331_s5 + $0x20] sm:$0xff]  }
 0x167   :  { %v1471_v54 = vadd.f32 %v1470_v52, %v1428_v50  ;;  %v1649_v55 = vmax.f32 %v1469_v49, 0.0  ;;  %v1507_v61 = vpop.f32.mrf.mxu1  ;;  %v3065_v49 = vld [vmem:[%s3331_s5 + $0x58] sm:$0xff]   ;;  %v3067_v52 = vld [vmem:[%s3331_s5 + $0x50] sm:$0xff]  }
 0x168   :  { %v1508_v19 = vadd.f32 %v1507_v61, %v273_v12  ;;  %v3066_v50 = vld [vmem:[%s3331_s5 + $0x18] sm:$0xff]  }
 0x169   :  { %v1650_v57 = vmax.f32 %v1471_v54, 0.0  ;;  %v1653_v60 = vpack.c.bf16 %v1649_v55, %v1645_v58  ;;  %v1509_v62 = vpop.f32.mrf.mxu1  ;;  %v3069_v54 = vld [vmem:[%s3331_s5 + $0x48] sm:$0xff]  }
 0x16a   :  { %v1510_v17 = vadd.f32 %v1509_v62, %v277_v9  ;;  %v3070_v55 = vld [vmem:[%s3331_s5 + $0x8] sm:$0xff]  }
 0x16b   :  { %v1654_v59 = vpack.c.bf16 %v1650_v57, %v1646_v56  ;;  %v1511_v63 = vpop.f32.mrf.mxu1  ;;  %v3071_v56 = vld [vmem:[%s3331_s5 + $0x40] sm:$0xff]  }
 0x16c   :  { %v1512_v18 = vadd.f32 %v1511_v63, %v273_v12  ;;  %v3072_v57 = vld [vmem:[%s3331_s5] sm:$0xff]  }
 0x16d   :  { %2085 = vmatprep.mubr.bf16.mxu0 %v1654_v59  ;;  %v1513_v1 = vpop.f32.mrf.mxu1 }
 0x16e   :  { %2086 = vmatmul.mubr.bf16.vlgmr.msra.gmra.mxu0 %v1653_v60  ;;  %v1514_v22 = vadd.f32 %v1513_v1, %v277_v9  ;;  %v1721_v60 = vld [vmem:[%s3330_s4] sm:$0x3] }
 0x16f   :  { %2628 = vmatpush3.bf16.msra.mxu0 %v3058_v14  ;;  %v1730_v62 = vrot.slane %v1721_v60, %v268_v27  ;;  %v1726_v63 = vrot.slane %v1721_v60, %v264_v5 }
 0x170   :  { %2629 = vmatprep.subr.bf16.mxu0 %v3059_v38 }
 0x173   :  { %2630 = vmatpush3.bf16.msra.mxu0 %v3060_v42 }
 0x174   :  { %2631 = vmatprep.subr.bf16.mxu0 %v3061_v44 }
 0x177   :  { %2632 = vmatpush3.bf16.msra.mxu0 %v3062_v46 }
 0x178   :  { %2633 = vmatprep.subr.bf16.mxu0 %v3063_v47 }
 0x17b   :  { %2634 = vmatpush3.bf16.msra.mxu0 %v3064_v48 }
 0x17c   :  { %2635 = vmatprep.subr.bf16.mxu0 %v3065_v49 }
 0x17f   :  { %2636 = vmatpush3.bf16.msra.mxu0 %v3066_v50 }
 0x180   :  { %2637 = vmatprep.subr.bf16.mxu0 %v3067_v52 }
 0x183   :  { %2638 = vmatpush3.bf16.msra.mxu0 %v3068_v53 }
 0x184   :  { %2639 = vmatprep.subr.bf16.mxu0 %v3069_v54 }
 0x187   :  { %2640 = vmatpush3.bf16.msra.mxu0 %v3070_v55 }
 0x188   :  { %2641 = vmatprep.subr.bf16.mxu0 %v3071_v56 }
 0x18b   :  { %2642 = vmatpush3.bf16.msra.mxu0 %v3072_v57 }
 0x19e   :  { %v1550_v0 = vpop.f32.mrf.mxu0 }
 0x19f   :  { %v1551_v26 = vadd.f32 %v1550_v0, %v1508_v19 }
 0x1a0   :  { %v1552_v6 = vpop.f32.mrf.mxu0 }
 0x1a1   :  { %v1553_v23 = vadd.f32 %v1552_v6, %v1510_v17 }
 0x1a2   :  { %v1554_v13 = vpop.f32.mrf.mxu0 }
 0x1a3   :  { %v1555_v25 = vadd.f32 %v1554_v13, %v1512_v18 }
 0x1a4   :  { %v1556_v20 = vpop.f32.mrf.mxu0 }
 0x1a5   :  { %v1557_v30 = vadd.f32 %v1556_v20, %v1514_v22  ;;  %v2610_v22 = vld [vmem:[%s3332_s6] ss:$0 sm:$0xff] }
 0x1a7   :  { %v1593_v7 = vpop.f32.mrf.mxu1 }
 0x1a8   :  { %v1594_v32 = vadd.f32 %v1593_v7, %v1551_v26 }
 0x1a9   :  { %v1595_v8 = vpop.f32.mrf.mxu1 }
 0x1aa   :  { %v1596_v51 = vadd.f32 %v1595_v8, %v1553_v23 }
 0x1ab   :  { %v1597_v15 = vpop.f32.mrf.mxu1 }
 0x1ac   :  { %v1598_v31 = vadd.f32 %v1597_v15, %v1555_v25 }
 0x1ad   :  { %v1599_v16 = vpop.f32.mrf.mxu1 }
 0x1ae   :  { %v1600_v10 = vadd.f32 %v1599_v16, %v1557_v30 }
 0x1af   :  { %v1636_v21 = vpop.f32.mrf.mxu1 }
 0x1b0   :  { %v1637_v34 = vadd.f32 %v1636_v21, %v1594_v32 }
 0x1b1   :  { %v1638_v28 = vpop.f32.mrf.mxu1 }
 0x1b2   :  { %v1639_v29 = vadd.f32 %v1638_v28, %v1596_v51  ;;  %v1647_v41 = vmax.f32 %v1637_v34, 0.0 }
 0x1b3   :  { %v1640_v4 = vpop.f32.mrf.mxu1 }
 0x1b4   :  { %v1641_v11 = vadd.f32 %v1640_v4, %v1598_v31  ;;  %v1648_v39 = vmax.f32 %v1639_v29, 0.0 }
 0x1b5   :  { %v1642_v35 = vpop.f32.mrf.mxu1 }
 0x1b6   :  { %v1643_v36 = vadd.f32 %v1642_v35, %v1600_v10  ;;  %v1651_v33 = vmax.f32 %v1641_v11, 0.0 }
 0x1b8   :  { %v1652_v40 = vmax.f32 %v1643_v36, 0.0  ;;  %v1655_v45 = vpack.c.bf16 %v1651_v33, %v1647_v41 }
 0x1ba   :  { %v1656_v43 = vpack.c.bf16 %v1652_v40, %v1648_v39 }
 0x1bc   :  { %2128 = vmatprep.mubr.bf16.mxu1 %v1656_v43 }
 0x1bd   :  { %2129 = vmatmul.mubr.bf16.vlgmr.msra.gmra.mxu1 %v1655_v45 }
 0x22e   :  { %v2087_v58 = vpop.f32.mrf.mxu0 }
 0x22f   :  { %v2088_v7 = vadd.f32 %v2087_v58, %v1726_v63 }
 0x230   :  { %v2089_v59 = vpop.f32.mrf.mxu0 }
 0x231   :  { %v2090_v3 = vadd.f32 %v2089_v59, %v1730_v62 }
 0x232   :  { %v2091_v61 = vpop.f32.mrf.mxu0 }
 0x233   :  { %v2092_v6 = vadd.f32 %v2091_v61, %v1726_v63 }
 0x234   :  { %v2093_v1 = vpop.f32.mrf.mxu0 }
 0x235   :  { %v2094_v9 = vadd.f32 %v2093_v1, %v1730_v62 }
 0x27d   :  { %v2130_v0 = vpop.f32.mrf.mxu1 }
 0x27e   :  { %v2131_v15 = vadd.f32 %v2130_v0, %v2088_v7 }
 0x27f   :  { %v2132_v2 = vpop.f32.mrf.mxu1 }
 0x280   :  { %v2133_v12 = vadd.f32 %v2132_v2, %v2090_v3  ;;  %v2139_v27 = vmax.f32 %v2131_v15, 0.0 }
 0x281   :  { %v2134_v8 = vpop.f32.mrf.mxu1 }
 0x282   :  { %v2135_v13 = vadd.f32 %v2134_v8, %v2092_v6  ;;  %v2140_v19 = vmax.f32 %v2133_v12, 0.0 }
 0x283   :  { %v2136_v16 = vpop.f32.mrf.mxu1 }
 0x284   :  { %v2137_v17 = vadd.f32 %v2136_v16, %v2094_v9  ;;  %v2141_v18 = vmax.f32 %v2135_v13, 0.0 }
 0x286   :  { %v2142_v20 = vmax.f32 %v2137_v17, 0.0  ;;  %v2143_v24 = vpack.c.bf16 %v2141_v18, %v2139_v27 }
 0x288   :  { %v2144_v21 = vpack.c.bf16 %v2142_v20, %v2140_v19 }
 0x28a   :  { %2312 = vmatprep.mubr.bf16.mxu0 %v2144_v21 }
 0x28b   :  { %2313 = vmatmul.mubr.bf16.vlgmr.msra.gmra.mxu0 %v2143_v24 }
 0x34b   :  { %v2643_v5 = vpop.f32.mrf.mxu0 }
 0x34d   :  { %v2644_v23 = vpop.f32.mrf.mxu0 }
 0x34e   :  { %v2645_v25 = vadd.f32 %v2644_v23, %v2643_v5 }
 0x34f   :  { %v2646_v26 = vpop.f32.mrf.mxu0 }
 0x350   :  { %v2315_v28 = vadd.f32 %v2645_v25, %v2610_v22 }
 0x351   :  { %v2647_v30 = vpop.f32.mrf.mxu0 }
 0x352   :  { %2321 = vst [vmem:[#allocation7] sm:$0xff] %v2315_v28  ;;  %v2648_v51 = vadd.f32 %v2647_v30, %v2646_v26 }
 0x354   :  { %v2318_v31 = vadd.f32 %v2648_v51, %v2610_v22 }
 0x356   :  { %2322 = vst [vmem:[#allocation7 + $0x8] sm:$0xff] %v2318_v31 }
 0x357   :  { %3124 = shalt.err (!%p3121_p0)
}
 0x358   :  { %2334 = dma.vmem_to_hbm [thread:$0]  %s2329_s3, 256, %s3333_s7, [#allocation4], %s3143_s11, %s3143_s11, %s3144_s12  }
 0x359   :  { %3137 = dma.done.wait [#allocation4], 256  }
 0x35a   :  { %3138 = vsyncadd [#allocation4], 4294967040 }
 0x35b   :  { %2338 = vsyncpa [#allocation3], 1 }
 0x35c   :  { %2339 = vsyncpa [#allocation6], 1 }
 0x35d   :  { %2340 = vsyncpa [#allocation4], 1 }

</bundles_post_ra>
